<compile_context>
chip_gen: v6e
topology: v6e:2x2x1
jax: 0.10.0
libtpu: 0.0.40
codegen_flags: <defaults>
</compile_context>

<pallas_src>
import jax
import jax.numpy as jnp
from jax.experimental import pallas as pl
from jax.experimental.pallas import tpu as pltpu

HIDDEN_SIZE = 32          # `hidden_size` global in the reference module
IN_FEATURES = 64
OUT_FEATURES = 10
NEG_SLOPE = 0.01          # nn.LeakyReLU() default
MAX_BATCH_TILE = 8192     # rows per grid step (lane-aligned; ~15 MiB peak VMEM)


def _leaky_relu(x):
    return jnp.where(x >= 0, x, NEG_SLOPE * x)


def _stable_sigmoid(z):
    # exp(-|z|) never overflows; one EUP exp + one EUP approx reciprocal,
    # then a single select/multiply on the VPU.
    e = jnp.exp(-jnp.abs(z))
    inv = pl.reciprocal(1.0 + e, approx=True)
    return jnp.where(z >= 0, 1.0, e) * inv


def _mlp_kernel(x_ref, w1_ref, b1_ref, w2_ref, b2_ref, w3_ref, b3_ref, o_ref):
    # [TB, 64] -> [64, TB]: put batch on the lane axis.  In-kernel transpose
    # runs on the XLU (own VLIW slot); a wrapper-side x.T would cost an extra
    # full HBM read+write pass over x.
    a = jnp.transpose(x_ref[...])
    # Layer 1: [32, 64] @ [64, TB] -> [32, TB], + bias [32, 1], LeakyReLU.
    a = jnp.dot(w1_ref[...], a, preferred_element_type=jnp.float32) + b1_ref[...]
    a = _leaky_relu(a)
    # Layer 2: [32, 32] @ [32, TB] -> [32, TB].
    a = jnp.dot(w2_ref[...], a, preferred_element_type=jnp.float32) + b2_ref[...]
    a = _leaky_relu(a)
    # Output layer: [10, 32] @ [32, TB] -> [10, TB], + bias, sigmoid.
    z = jnp.dot(w3_ref[...], a, preferred_element_type=jnp.float32) + b3_ref[...]
    o_ref[...] = _stable_sigmoid(z).astype(o_ref.dtype)


def _round_up(n, m):
    return ((n + m - 1) // m) * m


def _pick_batch_tile(B):
    # Small batches: one full-array tile (block dim == array dim is always legal).
    if B <= 512:
        return B
    # Large batches: aim for >=4 grid steps so both v7x TensorCores get work,
    # keep the tile a multiple of 128 (lane dim of the [10, TB] output block,
    # sublane-aligned for the [TB, 64] input block), and cap for VMEM.
    return min(MAX_BATCH_TILE, _round_up(pl.cdiv(B, 4), 128))


def prepare_params(w1, b1, w2, b2, w3, b3):
    """Weights stay in native PyTorch [out, in] layout (feature-major compute
    needs no transpose); biases become [out, 1] columns so they broadcast
    along the lane (batch) axis."""
    return (w1, b1.reshape(-1, 1), w2, b2.reshape(-1, 1), w3, b3.reshape(-1, 1))


def feedforward_nn_prepared(x, w1, b1c, w2, b2c, w3, b3c):
    """x: [B, 64] float32.  Returns the feature-major result [10, B]."""
    B = x.shape[0]
    TB = _pick_batch_tile(B)
    grid = (pl.cdiv(B, TB),)

    const = lambda i: (0, 0)   # weights/biases: fetched once, VMEM-resident
    in_specs = [
        pl.BlockSpec((TB, IN_FEATURES), lambda i: (i, 0)),        # x  (streamed)
        pl.BlockSpec((HIDDEN_SIZE, IN_FEATURES), const),          # w1 [32, 64]
        pl.BlockSpec((HIDDEN_SIZE, 1), const),                    # b1 [32, 1]
        pl.BlockSpec((HIDDEN_SIZE, HIDDEN_SIZE), const),          # w2 [32, 32]
        pl.BlockSpec((HIDDEN_SIZE, 1), const),                    # b2 [32, 1]
        pl.BlockSpec((OUT_FEATURES, HIDDEN_SIZE), const),         # w3 [10, 32]
        pl.BlockSpec((OUT_FEATURES, 1), const),                   # b3 [10, 1]
    ]
    out_spec = pl.BlockSpec((OUT_FEATURES, TB), lambda i: (0, i))  # lane-dense

    return pl.pallas_call(
        _mlp_kernel,
        out_shape=jax.ShapeDtypeStruct((OUT_FEATURES, B), jnp.float32),
        grid=grid,
        in_specs=in_specs,
        out_specs=out_spec,
        compiler_params=pltpu.CompilerParams(
            dimension_semantics=("parallel",),    # shard batch across v7x's 2 TCs
            vmem_limit_bytes=32 * 1024 * 1024),   # raise v5e's 16 MiB default
    )(x, w1, b1c, w2, b2c, w3, b3c)


def feedforward_nn(x, w1, b1, w2, b2, w3, b3):
    """Module-equivalent entry point: PyTorch-convention params, [B, 10] out."""
    out_t = feedforward_nn_prepared(x, *prepare_params(w1, b1, w2, b2, w3, b3))
    # Tiny (40 B/row); callers that can consume [10, B] directly should use
    # feedforward_nn_prepared to skip this transpose entirely.
    return out_t.T


def _init_params(key):
    """Deterministic init mimicking nn.Linear default (uniform +/- 1/sqrt(fan_in))."""
    ks = jax.random.split(key, 6)

    def lin(kw, kb, fan_in, fan_out):
        bound = 1.0 / jnp.sqrt(fan_in)
        w = jax.random.uniform(kw, (fan_out, fan_in), jnp.float32, -bound, bound)
        b = jax.random.uniform(kb, (fan_out,), jnp.float32, -bound, bound)
        return w, b

    w1, b1 = lin(ks[0], ks[1], IN_FEATURES, HIDDEN_SIZE)
    w2, b2 = lin(ks[2], ks[3], HIDDEN_SIZE, HIDDEN_SIZE)
    w3, b3 = lin(ks[4], ks[5], HIDDEN_SIZE, OUT_FEATURES)
    return w1, b1, w2, b2, w3, b3


def _reference(x, w1, b1, w2, b2, w3, b3):
    a = _leaky_relu(x @ w1.T + b1)
    a = _leaky_relu(a @ w2.T + b2)
    return jax.nn.sigmoid(a @ w3.T + b3)


if __name__ == "__main__":
    key = jax.random.PRNGKey(0)
    k_x, k_p = jax.random.split(key)
    params = _init_params(k_p)

    # Tolerance accounts for the EUP approximate reciprocal inside the sigmoid.
    tol = dict(atol=5e-3, rtol=5e-3)

    # Small batch: single grid step, full-array tiles.
    x_small = jax.random.normal(k_x, (8, IN_FEATURES), jnp.float32)
    out_small = jax.block_until_ready(feedforward_nn(x_small, *params))
    ref_small = _reference(x_small, *params)
    assert out_small.shape == (8, OUT_FEATURES)
    assert jnp.allclose(out_small, ref_small, **tol), "small-batch mismatch vs reference"

    # Larger batch: 4 lane-aligned tiles -> exercises the streamed pipeline
    # and gives the v7x 'parallel' axis real work for both TensorCores.
    x_big = jax.random.normal(k_x, (1024, IN_FEATURES), jnp.float32)
    out_big = jax.block_until_ready(feedforward_nn(x_big, *params))
    ref_big = _reference(x_big, *params)
    assert out_big.shape == (1024, OUT_FEATURES)
    assert jnp.allclose(out_big, ref_big, **tol), "multi-tile mismatch vs reference"

    print("KERNEL_OK")
</pallas_src>

<mosaic_0001>
module attributes {stable_mosaic.version = 11 : i64} {
  func.func @_mlp_kernel(%arg0: i32, %arg1: memref<8x64xf32, #tpu.memory_space<vmem>>, %arg2: memref<32x64xf32, #tpu.memory_space<vmem>>, %arg3: memref<32x1xf32, #tpu.memory_space<vmem>>, %arg4: memref<32x32xf32, #tpu.memory_space<vmem>>, %arg5: memref<32x1xf32, #tpu.memory_space<vmem>>, %arg6: memref<10x32xf32, #tpu.memory_space<vmem>>, %arg7: memref<10x1xf32, #tpu.memory_space<vmem>>, %arg8: memref<10x8xf32, #tpu.memory_space<vmem>>) attributes {dimension_semantics = [#tpu.dimension_semantics<parallel>], iteration_bounds = array<i64: 1>, scalar_prefetch = 0 : i64, scratch_operands = 0 : i64, tpu.core_type = #tpu.core_type<tc>, window_params = [{transform_indices = @transform_0, window_bounds = array<i64: 8, 64>}, {pipeline_mode = #tpu.pipeline_mode<synchronous>, transform_indices = @transform_1, window_bounds = array<i64: 32, 64>}, {pipeline_mode = #tpu.pipeline_mode<synchronous>, transform_indices = @transform_2, window_bounds = array<i64: 32, 1>}, {pipeline_mode = #tpu.pipeline_mode<synchronous>, transform_indices = @transform_3, window_bounds = array<i64: 32, 32>}, {pipeline_mode = #tpu.pipeline_mode<synchronous>, transform_indices = @transform_4, window_bounds = array<i64: 32, 1>}, {pipeline_mode = #tpu.pipeline_mode<synchronous>, transform_indices = @transform_5, window_bounds = array<i64: 10, 32>}, {pipeline_mode = #tpu.pipeline_mode<synchronous>, transform_indices = @transform_6, window_bounds = array<i64: 10, 1>}, {transform_indices = @transform_7, window_bounds = array<i64: 10, 8>}]} {
    %c0 = arith.constant 0 : index
    %c0_0 = arith.constant 0 : index
    %0 = vector.load %arg1[%c0, %c0_0] : memref<8x64xf32, #tpu.memory_space<vmem>>, vector<8x64xf32>
    %1 = tpu.transpose %0, [1, 0] : vector<8x64xf32> -> vector<64x8xf32>
    %c0_1 = arith.constant 0 : index
    %c0_2 = arith.constant 0 : index
    %2 = vector.load %arg2[%c0_1, %c0_2] : memref<32x64xf32, #tpu.memory_space<vmem>>, vector<32x64xf32>
    %cst = arith.constant dense<0.000000e+00> : vector<32x8xf32>
    %3 = tpu.matmul %2, %1, %cst {dimension_numbers = #tpu.dot_dimension_numbers<[1], [0], [0], [1], [0, 0, 1, 1], [], []>} : vector<32x64xf32>, vector<64x8xf32>, vector<32x8xf32> -> vector<32x8xf32>
    %c0_3 = arith.constant 0 : index
    %c0_4 = arith.constant 0 : index
    %4 = vector.load %arg3[%c0_3, %c0_4] : memref<32x1xf32, #tpu.memory_space<vmem>>, vector<32x1xf32>
    %5 = vector.broadcast %4 : vector<32x1xf32> to vector<32x8xf32>
    %6 = arith.addf %3, %5 : vector<32x8xf32>
    %cst_5 = arith.constant 0.000000e+00 : f32
    %7 = vector.broadcast %cst_5 : f32 to vector<32x8xf32>
    %8 = arith.cmpf oge, %6, %7 : vector<32x8xf32>
    %cst_6 = arith.constant 0.00999999977 : f32
    %9 = vector.broadcast %cst_6 : f32 to vector<32x8xf32>
    %10 = arith.mulf %9, %6 : vector<32x8xf32>
    %11 = arith.select %8, %6, %10 : vector<32x8xi1>, vector<32x8xf32>
    %c0_7 = arith.constant 0 : index
    %c0_8 = arith.constant 0 : index
    %12 = vector.load %arg4[%c0_7, %c0_8] : memref<32x32xf32, #tpu.memory_space<vmem>>, vector<32x32xf32>
    %cst_9 = arith.constant dense<0.000000e+00> : vector<32x8xf32>
    %13 = tpu.matmul %12, %11, %cst_9 {dimension_numbers = #tpu.dot_dimension_numbers<[1], [0], [0], [1], [0, 0, 1, 1], [], []>} : vector<32x32xf32>, vector<32x8xf32>, vector<32x8xf32> -> vector<32x8xf32>
    %c0_10 = arith.constant 0 : index
    %c0_11 = arith.constant 0 : index
    %14 = vector.load %arg5[%c0_10, %c0_11] : memref<32x1xf32, #tpu.memory_space<vmem>>, vector<32x1xf32>
    %15 = vector.broadcast %14 : vector<32x1xf32> to vector<32x8xf32>
    %16 = arith.addf %13, %15 : vector<32x8xf32>
    %cst_12 = arith.constant 0.000000e+00 : f32
    %17 = vector.broadcast %cst_12 : f32 to vector<32x8xf32>
    %18 = arith.cmpf oge, %16, %17 : vector<32x8xf32>
    %cst_13 = arith.constant 0.00999999977 : f32
    %19 = vector.broadcast %cst_13 : f32 to vector<32x8xf32>
    %20 = arith.mulf %19, %16 : vector<32x8xf32>
    %21 = arith.select %18, %16, %20 : vector<32x8xi1>, vector<32x8xf32>
    %c0_14 = arith.constant 0 : index
    %c0_15 = arith.constant 0 : index
    %22 = vector.load %arg6[%c0_14, %c0_15] : memref<10x32xf32, #tpu.memory_space<vmem>>, vector<10x32xf32>
    %cst_16 = arith.constant dense<0.000000e+00> : vector<10x8xf32>
    %23 = tpu.matmul %22, %21, %cst_16 {dimension_numbers = #tpu.dot_dimension_numbers<[1], [0], [0], [1], [0, 0, 1, 1], [], []>} : vector<10x32xf32>, vector<32x8xf32>, vector<10x8xf32> -> vector<10x8xf32>
    %c0_17 = arith.constant 0 : index
    %c0_18 = arith.constant 0 : index
    %24 = vector.load %arg7[%c0_17, %c0_18] : memref<10x1xf32, #tpu.memory_space<vmem>>, vector<10x1xf32>
    %25 = vector.broadcast %24 : vector<10x1xf32> to vector<10x8xf32>
    %26 = arith.addf %23, %25 : vector<10x8xf32>
    %27 = math.absf %26 : vector<10x8xf32>
    %cst_19 = arith.constant 0.000000e+00 : f32
    %28 = vector.broadcast %cst_19 : f32 to vector<10x8xf32>
    %29 = arith.subf %28, %27 : vector<10x8xf32>
    %30 = math.exp %29 : vector<10x8xf32>
    %cst_20 = arith.constant 1.000000e+00 : f32
    %31 = vector.broadcast %cst_20 : f32 to vector<10x8xf32>
    %32 = arith.addf %31, %30 : vector<10x8xf32>
    %33 = tpu.reciprocal %32 {approx = true} : vector<10x8xf32> -> vector<10x8xf32>
    %cst_21 = arith.constant 0.000000e+00 : f32
    %34 = vector.broadcast %cst_21 : f32 to vector<10x8xf32>
    %35 = arith.cmpf oge, %26, %34 : vector<10x8xf32>
    %cst_22 = arith.constant 1.000000e+00 : f32
    %36 = vector.broadcast %cst_22 : f32 to vector<10x8xf32>
    %37 = arith.select %35, %36, %30 : vector<10x8xi1>, vector<10x8xf32>
    %38 = arith.mulf %37, %33 : vector<10x8xf32>
    %c0_23 = arith.constant 0 : index
    %c0_24 = arith.constant 0 : index
    %39 = vector.load %arg8[%c0_23, %c0_24] : memref<10x8xf32, #tpu.memory_space<vmem>>, vector<10x8xf32>
    tpu.vector_store %arg8[%c0_23, %c0_24], %38 {strides = array<i32>} : memref<10x8xf32, #tpu.memory_space<vmem>>, vector<10x8xf32>,
    return
  }
  func.func @transform_0(%arg0: i32) -> (i32, i32) {
    %c0_i32 = arith.constant 0 : i32
    %c0_i32_0 = arith.constant 0 : i32
    return %arg0, %c0_i32 : i32, i32
  }
  func.func @transform_1(%arg0: i32) -> (i32, i32) {
    %c0_i32 = arith.constant 0 : i32
    %c0_i32_0 = arith.constant 0 : i32
    %c0_i32_1 = arith.constant 0 : i32
    return %c0_i32, %c0_i32_0 : i32, i32
  }
  func.func @transform_2(%arg0: i32) -> (i32, i32) {
    %c0_i32 = arith.constant 0 : i32
    %c0_i32_0 = arith.constant 0 : i32
    %c0_i32_1 = arith.constant 0 : i32
    return %c0_i32, %c0_i32_0 : i32, i32
  }
  func.func @transform_3(%arg0: i32) -> (i32, i32) {
    %c0_i32 = arith.constant 0 : i32
    %c0_i32_0 = arith.constant 0 : i32
    %c0_i32_1 = arith.constant 0 : i32
    return %c0_i32, %c0_i32_0 : i32, i32
  }
  func.func @transform_4(%arg0: i32) -> (i32, i32) {
    %c0_i32 = arith.constant 0 : i32
    %c0_i32_0 = arith.constant 0 : i32
    %c0_i32_1 = arith.constant 0 : i32
    return %c0_i32, %c0_i32_0 : i32, i32
  }
  func.func @transform_5(%arg0: i32) -> (i32, i32) {
    %c0_i32 = arith.constant 0 : i32
    %c0_i32_0 = arith.constant 0 : i32
    %c0_i32_1 = arith.constant 0 : i32
    return %c0_i32, %c0_i32_0 : i32, i32
  }
  func.func @transform_6(%arg0: i32) -> (i32, i32) {
    %c0_i32 = arith.constant 0 : i32
    %c0_i32_0 = arith.constant 0 : i32
    %c0_i32_1 = arith.constant 0 : i32
    return %c0_i32, %c0_i32_0 : i32, i32
  }
  func.func @transform_7(%arg0: i32) -> (i32, i32) {
    %c0_i32 = arith.constant 0 : i32
    %c0_i32_0 = arith.constant 0 : i32
    return %c0_i32, %arg0 : i32, i32
  }
}

</mosaic_0001>

<bundles_post_ra>
// kernel: tpu_custom_call.1
= control target key start
LH: loop header
LB: loop body
LE: loop exit
PB: predicated region body
PF: predicated region fallthrough
CT: control target
= control target key end

     0   :  { %12 = vsyncpa [#allocation3], 0  ;;  %s537_s24 = smov [#allocation2]   ;;  %s660_s0 = inlined_call_operand.hbm [shape: f32[8,64], index: 0, kind: input, shape index: {}]   ;;  %s661_s1 = inlined_call_operand.vmem [shape: f32[32,64], index: 1, kind: input, shape index: {}]   ;;  %s662_s2 = inlined_call_operand.vmem [shape: f32[32,1], index: 2, kind: input, shape index: {}]   ;;  %s663_s3 = inlined_call_operand.vmem [shape: f32[32,32], index: 3, kind: input, shape index: {}]   ;;  %s664_s4 = inlined_call_operand.vmem [shape: f32[32,1], index: 4, kind: input, shape index: {}]   ;;  %s665_s5 = inlined_call_operand.vmem [shape: f32[10,32], index: 5, kind: input, shape index: {}]   ;;  %s666_s6 = inlined_call_operand.vmem [shape: f32[10,1], index: 6, kind: input, shape index: {}]   ;;  %s667_s7 = inlined_call_operand.vmem [shape: f32[10,8], index: 7, kind: output, shape index: {}]  }
   0x1   :  { %s19_s25 = sshll.u32 %s537_s24, 4  ;;  %s20_s25 = int_to_ptr.vmem [resolvable:$true] %s19_s25 }
   0x2   :  { %s523_s26 = scalar_lea.vmem %s20_s25, 128  ;;  %p528_p1 = scmp.lt.s32.totalorder %s20_s25, %s20_s25 }
   0x3   :  { %p524_p0 = scmp.ne.s32.totalorder %s20_s25, %s523_s26  ;;  %p529_p2 = scmp.lt.s32.totalorder %s523_s26, %s523_s26 }
   0x5   :  { %p530_p3 = por %p529_p2, %p528_p1 }
   0x7   :  { %p531_p4 = pnand %p530_p3, %p524_p0 }
   0x9   :  { %534 = shalt.err (!%p531_p4)
}
   0xa   :  { %22 = dma.hbm_to_vmem [thread:$0]  %s660_s0, 128, %s20_s25, [#allocation3]  }
   0xb   :  { %535 = dma.done.wait [#allocation3], 128  }
   0xc   :  { %536 = vsyncadd [#allocation3], 4294967168  ;;  %v538_v0 = vmov 0   ;;  %vm67_vm0 = vcmask 523264   ;;  %v38_v1 = vld [vmem:[#allocation2] sm:$0xff]  ;;  %v46_v3 = vld [vmem:[%s662_s2 + $0x18] sm:$0xff] }
   0xd   :  { %505 = vset.pattern.permute.xlu0 %v538_v0  ;;  %506 = vset.pattern.permute.xlu1 %v538_v0  ;;  %v39_v2 = vld [vmem:[%s661_s1] sm:$0xff]  ;;  %v40_v4 = vld [vmem:[%s661_s1 + $0x8] sm:$0xff]  ;;  %v41_v6 = vld [vmem:[%s661_s1 + $0x10] sm:$0xff]  ;;  %vm208_vm1 = vcmask 261120   ;;  %vm433_vm11 = vcmask 58368   ;;  %vm431_vm13 = vcmask 64512  }
   0xe   :  { %470 = vmatprep.subr.msk.mxu0 %vm67_vm0, %v38_v1  ;;  %472 = vmatprep.mubr.msk.f32.mxu0 %vm67_vm0, %v39_v2  ;;  %v44_v5 = vld [vmem:[%s662_s2 + $0x8] sm:$0xff]  ;;  %v45_v7 = vld [vmem:[%s662_s2 + $0x10] sm:$0xff]  ;;  %v43_v8 = vld [vmem:[%s662_s2] sm:$0xff] }
   0xf   :  { %471 = vmatpush3.xpose.msk.msra.mxu0 %vm67_vm0, %v38_v1  ;;  %64 = vperm.xlu0 %505, %v46_v3   ;;  %v42_v9 = vld [vmem:[%s661_s1 + $0x18] sm:$0xff]  ;;  %v186_v11 = vld [vmem:[%s664_s4 + $0x10] sm:$0xff]  ;;  %v185_v12 = vld [vmem:[%s664_s4 + $0x8] sm:$0xff] }
  0x10   :  { %54 = vperm.xlu1 %506, %v44_v5   ;;  %v187_v10 = vld [vmem:[%s664_s4 + $0x18] sm:$0xff]  ;;  %v184_v13 = vld [vmem:[%s664_s4] sm:$0xff]  ;;  %v321_v15 = vld [vmem:[%s666_s6 + $0x8] sm:$0x3] }
  0x11   :  { %v320_v14 = vld [vmem:[%s666_s6] sm:$0xff]  ;;  %v181_v37 = vld [vmem:[%s663_s3 + $0x8] sm:$0xff]  ;;  %v182_v38 = vld [vmem:[%s663_s3 + $0x10] sm:$0xff] }
  0x12   :  { %473 = vmatmul.mubr.msk.f32.vlgmr.msra.gmra.mxu0 %vm67_vm0, %v40_v4  ;;  %v180_v16 = vld [vmem:[%s663_s3] sm:$0xff]  ;;  %v183_v39 = vld [vmem:[%s663_s3 + $0x18] sm:$0xff]  ;;  %v319_v61 = vld [vmem:[%s665_s5 + $0x8] sm:$0x3] }
  0x13   :  { %475 = vmatprep.mubr.msk.f32.mxu0 %vm67_vm0, %v41_v6  ;;  %59 = vperm.xlu0 %505, %v45_v7   ;;  %v318_v40 = vld [vmem:[%s665_s5] sm:$0xff] }
  0x14   :  { %49 = vperm.xlu1 %506, %v43_v8   ;;  %486 = vmatprep.mubr.msk.f32.mxu1 %vm208_vm1, %v180_v16 }
  0x16   :  { %476 = vmatmul.mubr.msk.f32.gmra.mxu0 %vm67_vm0, %v42_v9 }
  0x17   :  { %205 = vperm.xlu0 %505, %v187_v10   ;;  %500 = vmatprep.mubr.msk.f32.mxu0 %vm208_vm1, %v318_v40 }
  0x18   :  { %200 = vperm.xlu1 %506, %v186_v11  }
  0x1b   :  { %195 = vperm.xlu0 %505, %v185_v12  }
  0x1c   :  { %190 = vperm.xlu1 %506, %v184_v13  }
  0x1f   :  { %324 = vperm.xlu0 %505, %v320_v14  }
  0x20   :  { %329 = vperm.xlu1 %506, %v321_v15  }
  0x8a   :  { %v65_v17 = vpop.permute.xlu0 %64 }
  0x8b   :  { %v55_v18 = vpop.permute.xlu1 %54 }
  0x8e   :  { %v60_v22 = vpop.permute.xlu0 %59 }
  0x8f   :  { %v50_v25 = vpop.permute.xlu1 %49 }
  0x92   :  { %v206_v41 = vpop.permute.xlu0 %205 }
  0x93   :  { %v201_v42 = vpop.permute.xlu1 %200 }
  0x96   :  { %v196_v45 = vpop.permute.xlu0 %195 }
  0x97   :  { %v191_v49 = vpop.permute.xlu1 %190 }
  0x9a   :  { %v325_v1 = vpop.permute.xlu0 %324 }
  0x9b   :  { %v330_v62 = vpop.permute.xlu1 %329 }
  0xd2   :  { %v474_v19 = vpop.f32.mrf.mxu0 }
  0xd3   :  { %v155_v23 = vadd.f32 %v474_v19, %v55_v18 }
  0xd4   :  { %v149_v20 = vpop.f32.mrf.mxu0 }
  0xd5   :  { %v150_v27 = vadd.f32 %v149_v20, %v50_v25  ;;  %v173_v30 = vmul.f32 0.01, %v155_v23  ;;  %vm169_vm4 = vcmp.ge.f32.partialorder %v155_v23, 0.0 }
  0xd6   :  { %v477_v21 = vpop.f32.mrf.mxu0 }
  0xd7   :  { %v165_v24 = vadd.f32 %v477_v21, %v65_v17  ;;  %v172_v33 = vmul.f32 0.01, %v150_v27  ;;  %vm168_vm5 = vcmp.ge.f32.partialorder %v150_v27, 0.0  ;;  %v177_v35 = vsel %vm169_vm4, %v155_v23, %v173_v30 }
  0xd8   :  { %v159_v26 = vpop.f32.mrf.mxu0 }
  0xd9   :  { %v160_v28 = vadd.f32 %v159_v26, %v60_v22  ;;  %vm171_vm2 = vcmp.ge.f32.partialorder %v165_v24, 0.0  ;;  %v175_v29 = vmul.f32 0.01, %v165_v24  ;;  %v176_v36 = vsel %vm168_vm5, %v150_v27, %v172_v33 }
  0xdb   :  { %v174_v31 = vmul.f32 0.01, %v160_v28  ;;  %v179_v32 = vsel %vm171_vm2, %v165_v24, %v175_v29  ;;  %vm170_vm3 = vcmp.ge.f32.partialorder %v160_v28, 0.0 }
  0xdc   :  { %478 = vmatprep.subr.mxu1 %v179_v32 }
  0xdd   :  { %479 = vmatpush3.msra.mxu1 %v179_v32  ;;  %v178_v34 = vsel %vm170_vm3, %v160_v28, %v174_v31 }
  0xde   :  { %480 = vmatprep.subr.mxu1 %v178_v34 }
  0xdf   :  { %481 = vmatpush3.msra.mxu1 %v178_v34 }
  0xe0   :  { %482 = vmatprep.subr.mxu1 %v177_v35 }
  0xe1   :  { %483 = vmatpush3.msra.mxu1 %v177_v35 }
  0xe2   :  { %484 = vmatprep.subr.mxu1 %v176_v36 }
  0xe3   :  { %485 = vmatpush3.msra.mxu1 %v176_v36 }
  0xe4   :  { %487 = vmatmul.mubr.msk.f32.vlgmr.msra.gmra.mxu1 %vm208_vm1, %v181_v37 }
  0xe5   :  { %489 = vmatprep.mubr.msk.f32.mxu1 %vm208_vm1, %v182_v38 }
  0xe8   :  { %490 = vmatmul.mubr.msk.f32.gmra.mxu1 %vm208_vm1, %v183_v39 }
 0x1a4   :  { %v488_v43 = vpop.f32.mrf.mxu1 }
 0x1a5   :  { %v293_v47 = vadd.f32 %v488_v43, %v196_v45 }
 0x1a6   :  { %v287_v44 = vpop.f32.mrf.mxu1 }
 0x1a7   :  { %v288_v51 = vadd.f32 %v287_v44, %v191_v49  ;;  %v311_v54 = vmul.f32 0.01, %v293_v47  ;;  %vm307_vm8 = vcmp.ge.f32.partialorder %v293_v47, 0.0 }
 0x1a8   :  { %v491_v46 = vpop.f32.mrf.mxu1 }
 0x1a9   :  { %v303_v48 = vadd.f32 %v491_v46, %v206_v41  ;;  %v310_v57 = vmul.f32 0.01, %v288_v51  ;;  %vm306_vm9 = vcmp.ge.f32.partialorder %v288_v51, 0.0  ;;  %v315_v59 = vsel %vm307_vm8, %v293_v47, %v311_v54 }
 0x1aa   :  { %v297_v50 = vpop.f32.mrf.mxu1 }
 0x1ab   :  { %v313_v52 = vmul.f32 0.01, %v303_v48  ;;  %v298_v53 = vadd.f32 %v297_v50, %v201_v42  ;;  %vm309_vm6 = vcmp.ge.f32.partialorder %v303_v48, 0.0  ;;  %v314_v60 = vsel %vm306_vm9, %v288_v51, %v310_v57 }
 0x1ad   :  { %v312_v55 = vmul.f32 0.01, %v298_v53  ;;  %v317_v56 = vsel %vm309_vm6, %v303_v48, %v313_v52  ;;  %vm308_vm7 = vcmp.ge.f32.partialorder %v298_v53, 0.0 }
 0x1ae   :  { %492 = vmatprep.subr.mxu0 %v317_v56 }
 0x1af   :  { %493 = vmatpush3.msra.mxu0 %v317_v56  ;;  %v316_v58 = vsel %vm308_vm7, %v298_v53, %v312_v55 }
 0x1b0   :  { %494 = vmatprep.subr.mxu0 %v316_v58 }
 0x1b1   :  { %495 = vmatpush3.msra.mxu0 %v316_v58 }
 0x1b2   :  { %496 = vmatprep.subr.mxu0 %v315_v59 }
 0x1b3   :  { %497 = vmatpush3.msra.mxu0 %v315_v59 }
 0x1b4   :  { %498 = vmatprep.subr.mxu0 %v314_v60 }
 0x1b5   :  { %499 = vmatpush3.msra.mxu0 %v314_v60 }
 0x1b6   :  { %501 = vmatmul.mubr.msk.f32.vlgmr.msra.gmra.mxu0 %vm208_vm1, %v319_v61 }
 0x276   :  { %v502_v63 = vpop.f32.mrf.mxu0 }
 0x277   :  { %v410_v0 = vadd.f32 %v502_v63, %v330_v62 }
 0x278   :  { %v404_v2 = vpop.f32.mrf.mxu0 }
 0x279   :  { %v414_v3 = vand.u32 2147483647, %v410_v0  ;;  %v405_v4 = vadd.f32 %v404_v2, %v325_v1  ;;  %vm426_vm10 = vcmp.ge.f32.partialorder %v410_v0, 0.0 }
 0x27b   :  { %v416_v5 = vsub.f32 0.0, %v414_v3  ;;  %v413_v6 = vand.u32 2147483647, %v405_v4  ;;  %vm425_vm12 = vcmp.ge.f32.partialorder %v405_v4, 0.0 }
 0x27d   :  { %v419_v7 = vmul.f32 1.442695, %v416_v5  ;;  %v415_v8 = vsub.f32 0.0, %v413_v6 }
 0x27f   :  { %507 = vpow2.f32 %v419_v7  ;;  %v417_v9 = vmul.f32 1.442695, %v415_v8 }
 0x281   :  { %509 = vpow2.f32 %v417_v9 }
 0x28c   :  { %v508_v10 = vpop.eup %507 }
 0x28d   :  { %v422_v11 = vadd.f32 1.0, %v508_v10  ;;  %v428_v15 = vsel %vm426_vm10, 1.0, %v508_v10 }
 0x28e   :  { %v510_v12 = vpop.eup %509 }
 0x28f   :  { %511 = vrcp.f32 %v422_v11  ;;  %v421_v13 = vadd.f32 1.0, %v510_v12  ;;  %v427_v18 = vsel %vm425_vm12, 1.0, %v510_v12 }
 0x291   :  { %513 = vrcp.f32 %v421_v13 }
 0x29c   :  { %v512_v14 = vpop.eup %511 }
 0x29d   :  { %v430_v16 = vmul.f32 %v512_v14, %v428_v15 }
 0x29e   :  { %v514_v17 = vpop.eup %513 }
 0x29f   :  { %434 = vst.msk [vmem:[%s667_s7 + $0x8] sm:$0x3] %vm433_vm11, %v430_v16  ;;  %v429_v19 = vmul.f32 %v514_v17, %v427_v18 }
 0x2a1   :  { %432 = vst.msk [vmem:[%s667_s7] sm:$0xff] %vm431_vm13, %v429_v19 }
 0x2a2   :  { %439 = vsyncpa [#allocation3], 1 }

</bundles_post_ra>
